<compile_context>
chip_gen: v5e
topology: v5e:2x2
jax: 0.10.0
libtpu: 0.0.40
codegen_flags: <defaults>
</compile_context>

<pallas_src>
import math

import jax
import jax.numpy as jnp
from jax import lax
from jax.experimental import pallas as pl
from jax.experimental.pallas import tpu as pltpu

# Budget for all per-step VMEM blocks (double-buffered tiles + constants).
_VMEM_TILE_BUDGET_BYTES = 16 * 1024 * 1024
# Explicit scoped-VMEM limit (> v5e 16 MiB default, < v7x 32 MiB scoped default).
_VMEM_LIMIT_BYTES = 28 * 1024 * 1024
# Cap on the lane tile when the subsample selection matmul is fused, so its MXU
# work (~T MAC per activation byte) stays at/under the HBM roofline even on the
# weakest MXU/HBM ratio; 2-byte activations can afford 2x more lanes.
_MAX_FUSED_LANES_4B = 256
_MAX_FUSED_LANES_2B = 512
# Below this Cin the channel contraction is an unrolled VPU multiply-add.
_SMALL_CIN = 16


def _make_kernel(*, cin, tin, hw_in, use_sel, ragged, small_cin):
    def kernel(*refs):
        if use_sel:
            x_ref, s_ref, w_ref, b_ref, o_ref = refs
        else:
            x_ref, w_ref, b_ref, o_ref = refs

        x = x_ref[0]                                       # (Cin, Tin) native dtype
        if ragged:
            # The last spatial tile can run past H*W: zero the stale tail so the
            # selection matmul cannot pick up garbage (NaN * 0 == NaN).
            t = pl.program_id(1)
            valid = lax.broadcasted_iota(jnp.int32, x.shape, 1) < (hw_in - t * tin)
            x = jnp.where(valid, x, jnp.zeros_like(x))

        if use_sel:
            # Fused stride-s subsample: 0/1 selection on the idle MXU (exact).
            xs = jnp.dot(x, s_ref[...], preferred_element_type=jnp.float32)
            xs = xs.astype(x.dtype)
        else:
            xs = x                                         # (Cin, T)

        if small_cin:
            # Tiny contraction dim: unrolled VPU outer-product accumulation beats
            # an MXU pass padded out to K=128/256.
            w = w_ref[...]
            y = w[:, 0:1].astype(jnp.float32) * xs[0:1, :].astype(jnp.float32)
            for c in range(1, cin):
                y = y + w[:, c:c + 1].astype(jnp.float32) * xs[c:c + 1, :].astype(jnp.float32)
        else:
            y = jnp.dot(w_ref[...], xs, preferred_element_type=jnp.float32)

        o_ref[0] = (y + b_ref[...]).astype(o_ref.dtype)

    return kernel


def _pick_lane_tile(m, wo, n, stride, itemsize, vmem_est):
    """Lane (spatial) tile: multiple of 128 (unmasked stores) and, when the
    subsample is fused, of Wo (whole output rows); within the VMEM budget and
    the selection-matmul roofline cap; >=4 grid blocks when possible (v7x)."""
    if stride > 1:
        base = wo * (128 // math.gcd(wo, 128))            # lcm(Wo, 128)
        cap = _MAX_FUSED_LANES_2B if itemsize <= 2 else _MAX_FUSED_LANES_4B
    else:
        base = 128
        cap = 4096
    if m <= base:
        return m                                           # single full-extent tile
    t = max(base, (min(m, cap) // base) * base)
    while t > base and vmem_est(t) > _VMEM_TILE_BUDGET_BYTES:
        t -= base
    # v7x megacore: prefer >= 4 total grid blocks so both TensorCores get work.
    if n * pl.cdiv(m, t) < 4:
        t2 = (m // pl.cdiv(4, n)) // base * base
        if t2 >= base:
            t = min(t, t2)
    return t


def downsample2d(x, conv_w, bn_gamma, bn_beta, bn_mean, bn_var, *,
                 stride, eps=1e-5, downsample_type="norm"):
    """Forward of DownSample2d (downsample_type='norm'), inference-mode BatchNorm.

    x      : (N, Cin, H, W)  any float dtype (kept native; f32 accumulation)
    conv_w : (Cout, Cin, 1, 1)  PyTorch Conv2d weight layout
    bn_*   : (Cout,)
    """
    if downsample_type != "norm" and stride != 1:
        raise NotImplementedError("only downsample_type='norm' is implemented")

    N, Cin, H, W = x.shape
    Cout = conv_w.shape[0]
    cdtype = x.dtype
    itemsize = jnp.dtype(cdtype).itemsize

    Ho = (H - 1) // stride + 1
    Wo = (W - 1) // stride + 1
    M = Ho * Wo

    # Fuse the subsample when stride tiles cleanly and the minimum legal lane
    # tile keeps the selection matmul under the HBM roofline; otherwise fall
    # back to an XLA pre-subsample + the stride-1 kernel.
    fuse = stride > 1 and H % stride == 0 and W % stride == 0
    if fuse:
        base = Wo * (128 // math.gcd(Wo, 128))
        cap = _MAX_FUSED_LANES_2B if itemsize <= 2 else _MAX_FUSED_LANES_4B
        fuse = min(M, base) <= cap
    if stride > 1 and not fuse:
        x = x[:, :, ::stride, ::stride]
        N, Cin, H, W = x.shape
    s_eff = stride if fuse else 1
    use_sel = s_eff > 1

    HW = H * W
    x_flat = x.reshape(N, Cin, HW)                         # free reshape, native dtype

    # Fold inference BatchNorm into the conv weight and a per-channel bias.
    scale = (bn_gamma.astype(jnp.float32) / jnp.sqrt(bn_var.astype(jnp.float32) + eps))
    w_fold = (conv_w.reshape(Cout, Cin).astype(jnp.float32) * scale[:, None]).astype(cdtype)
    bias = (bn_beta.astype(jnp.float32) - bn_mean.astype(jnp.float32) * scale).reshape(Cout, 1)

    def vmem_est(t):
        tin = t * s_eff * s_eff
        est = 2 * (Cin * tin + Cout * t) * itemsize        # act + out tiles (double buffered)
        est += 2 * (Cout * Cin * itemsize + Cout * 4)      # folded weight + bias (2 bufs each)
        if use_sel:
            est += 2 * tin * t * itemsize                  # selection matrix (2 bufs)
        return est

    T = _pick_lane_tile(M, Wo, N, s_eff, itemsize, vmem_est)
    Tin = T * s_eff * s_eff
    ragged = use_sel and (M % T != 0)
    grid = (N, pl.cdiv(M, T))

    kernel = _make_kernel(cin=Cin, tin=Tin, hw_in=HW, use_sel=use_sel,
                          ragged=ragged, small_cin=Cin <= _SMALL_CIN)

    in_specs = [pl.BlockSpec((1, Cin, Tin), lambda n, t: (n, 0, t))]
    args = [x_flat]
    if use_sel:
        rb = T // Wo                                        # whole output rows per tile
        rows = (jnp.arange(rb)[:, None] * (stride * W)
                + jnp.arange(Wo)[None, :] * stride).reshape(-1)
        sel = jnp.zeros((Tin, T), cdtype).at[rows, jnp.arange(T)].set(1)
        # Constant index_map: fetched once and reused across the whole grid.
        in_specs.append(pl.BlockSpec((Tin, T), lambda n, t: (0, 0)))
        args.append(sel)
    in_specs += [pl.BlockSpec((Cout, Cin), lambda n, t: (0, 0)),
                 pl.BlockSpec((Cout, 1), lambda n, t: (0, 0))]
    args += [w_fold, bias]

    out_flat = pl.pallas_call(
        kernel,
        out_shape=jax.ShapeDtypeStruct((N, Cout, M), cdtype),
        grid_spec=pltpu.PrefetchScalarGridSpec(
            num_scalar_prefetch=0,
            grid=grid,
            in_specs=in_specs,
            out_specs=pl.BlockSpec((1, Cout, T), lambda n, t: (n, 0, t)),
        ),
        compiler_params=pltpu.CompilerParams(
            dimension_semantics=("parallel", "parallel"),
            vmem_limit_bytes=_VMEM_LIMIT_BYTES),
    )(*args)

    # (N, Cout, Ho*Wo) -> (N, Cout, Ho, Wo): free reshape, already NCHW.
    return out_flat.reshape(N, Cout, Ho, Wo)


if __name__ == "__main__":
    key = jax.random.PRNGKey(0)
    k_x, k_w, k_g, k_b, k_m, k_v = jax.random.split(key, 6)

    # Small shapes consistent with the module: N=2, Cin=4, H=W=16, Cout=8, stride=2.
    N, Cin, H, W = 2, 4, 16, 16
    Cout, stride = 8, 2

    x = jax.random.normal(k_x, (N, Cin, H, W), dtype=jnp.float32)
    conv_w = jax.random.normal(k_w, (Cout, Cin, 1, 1), dtype=jnp.float32) * 0.1
    bn_gamma = 1.0 + 0.1 * jax.random.normal(k_g, (Cout,), dtype=jnp.float32)
    bn_beta = 0.1 * jax.random.normal(k_b, (Cout,), dtype=jnp.float32)
    bn_mean = 0.1 * jax.random.normal(k_m, (Cout,), dtype=jnp.float32)
    bn_var = jnp.abs(1.0 + 0.1 * jax.random.normal(k_v, (Cout,), dtype=jnp.float32))

    y = downsample2d(x, conv_w, bn_gamma, bn_beta, bn_mean, bn_var, stride=stride)
    jax.block_until_ready(y)

    # Reference check (plain JAX) of the same semantics.
    x_sub = x[:, :, ::stride, ::stride]
    ref = jnp.einsum("nchw,oc->nohw", x_sub, conv_w.reshape(Cout, Cin))
    scale = bn_gamma / jnp.sqrt(bn_var + 1e-5)
    ref = ref * scale[None, :, None, None] + (bn_beta - bn_mean * scale)[None, :, None, None]
    assert y.shape == (N, Cout, H // stride, W // stride)
    assert jnp.max(jnp.abs(y - ref)) < 2e-4

    print("KERNEL_OK")
</pallas_src>

<mosaic_0001>
module attributes {stable_mosaic.version = 11 : i64} {
  func.func @kernel(%arg0: i32, %arg1: i32, %arg2: memref<1x4x256xf32, #tpu.memory_space<vmem>>, %arg3: memref<256x64xf32, #tpu.memory_space<vmem>>, %arg4: memref<8x4xf32, #tpu.memory_space<vmem>>, %arg5: memref<8x1xf32, #tpu.memory_space<vmem>>, %arg6: memref<1x8x64xf32, #tpu.memory_space<vmem>>) attributes {dimension_semantics = [#tpu.dimension_semantics<parallel>, #tpu.dimension_semantics<parallel>], iteration_bounds = array<i64: 2, 1>, scalar_prefetch = 0 : i64, scratch_operands = 0 : i64, tpu.core_type = #tpu.core_type<tc>, window_params = [{transform_indices = @transform_0, window_bounds = array<i64: 1, 4, 256>}, {pipeline_mode = #tpu.pipeline_mode<synchronous>, transform_indices = @transform_1, window_bounds = array<i64: 256, 64>}, {pipeline_mode = #tpu.pipeline_mode<synchronous>, transform_indices = @transform_2, window_bounds = array<i64: 8, 4>}, {pipeline_mode = #tpu.pipeline_mode<synchronous>, transform_indices = @transform_3, window_bounds = array<i64: 8, 1>}, {transform_indices = @transform_4, window_bounds = array<i64: 1, 8, 64>}]} {
    %c0 = arith.constant 0 : index
    %c0_0 = arith.constant 0 : index
    %c0_1 = arith.constant 0 : index
    %0 = vector.load %arg2[%c0, %c0_0, %c0_1] : memref<1x4x256xf32, #tpu.memory_space<vmem>>, vector<1x4x256xf32>
    %1 = vector.shape_cast %0 : vector<1x4x256xf32> to vector<4x256xf32>
    %c0_2 = arith.constant 0 : index
    %c0_3 = arith.constant 0 : index
    %2 = vector.load %arg3[%c0_2, %c0_3] : memref<256x64xf32, #tpu.memory_space<vmem>>, vector<256x64xf32>
    %cst = arith.constant dense<0.000000e+00> : vector<4x64xf32>
    %3 = tpu.matmul %1, %2, %cst {dimension_numbers = #tpu.dot_dimension_numbers<[1], [0], [0], [1], [0, 0, 1, 1], [], []>} : vector<4x256xf32>, vector<256x64xf32>, vector<4x64xf32> -> vector<4x64xf32>
    %c0_4 = arith.constant 0 : index
    %c0_5 = arith.constant 0 : index
    %4 = vector.load %arg4[%c0_4, %c0_5] : memref<8x4xf32, #tpu.memory_space<vmem>>, vector<8x4xf32>
    %5 = vector.extract_strided_slice %4 {offsets = [0, 0], sizes = [8, 1], strides = [1, 1]} : vector<8x4xf32> to vector<8x1xf32>
    %6 = vector.extract_strided_slice %3 {offsets = [0, 0], sizes = [1, 64], strides = [1, 1]} : vector<4x64xf32> to vector<1x64xf32>
    %7 = vector.broadcast %5 : vector<8x1xf32> to vector<8x64xf32>
    %8 = vector.broadcast %6 : vector<1x64xf32> to vector<8x64xf32>
    %9 = arith.mulf %7, %8 : vector<8x64xf32>
    %10 = vector.extract_strided_slice %4 {offsets = [0, 1], sizes = [8, 1], strides = [1, 1]} : vector<8x4xf32> to vector<8x1xf32>
    %11 = vector.extract_strided_slice %3 {offsets = [1, 0], sizes = [1, 64], strides = [1, 1]} : vector<4x64xf32> to vector<1x64xf32>
    %12 = vector.broadcast %10 : vector<8x1xf32> to vector<8x64xf32>
    %13 = vector.broadcast %11 : vector<1x64xf32> to vector<8x64xf32>
    %14 = arith.mulf %12, %13 : vector<8x64xf32>
    %15 = arith.addf %9, %14 : vector<8x64xf32>
    %16 = vector.extract_strided_slice %4 {offsets = [0, 2], sizes = [8, 1], strides = [1, 1]} : vector<8x4xf32> to vector<8x1xf32>
    %17 = vector.extract_strided_slice %3 {offsets = [2, 0], sizes = [1, 64], strides = [1, 1]} : vector<4x64xf32> to vector<1x64xf32>
    %18 = vector.broadcast %16 : vector<8x1xf32> to vector<8x64xf32>
    %19 = vector.broadcast %17 : vector<1x64xf32> to vector<8x64xf32>
    %20 = arith.mulf %18, %19 : vector<8x64xf32>
    %21 = arith.addf %15, %20 : vector<8x64xf32>
    %22 = vector.extract_strided_slice %4 {offsets = [0, 3], sizes = [8, 1], strides = [1, 1]} : vector<8x4xf32> to vector<8x1xf32>
    %23 = vector.extract_strided_slice %3 {offsets = [3, 0], sizes = [1, 64], strides = [1, 1]} : vector<4x64xf32> to vector<1x64xf32>
    %24 = vector.broadcast %22 : vector<8x1xf32> to vector<8x64xf32>
    %25 = vector.broadcast %23 : vector<1x64xf32> to vector<8x64xf32>
    %26 = arith.mulf %24, %25 : vector<8x64xf32>
    %27 = arith.addf %21, %26 : vector<8x64xf32>
    %c0_6 = arith.constant 0 : index
    %c0_7 = arith.constant 0 : index
    %28 = vector.load %arg5[%c0_6, %c0_7] : memref<8x1xf32, #tpu.memory_space<vmem>>, vector<8x1xf32>
    %29 = vector.broadcast %28 : vector<8x1xf32> to vector<8x64xf32>
    %30 = arith.addf %27, %29 : vector<8x64xf32>
    %c0_8 = arith.constant 0 : index
    %c0_9 = arith.constant 0 : index
    %c0_10 = arith.constant 0 : index
    %31 = vector.load %arg6[%c0_8, %c0_9, %c0_10] : memref<1x8x64xf32, #tpu.memory_space<vmem>>, vector<1x8x64xf32>
    %32 = vector.shape_cast %31 : vector<1x8x64xf32> to vector<8x64xf32>
    %33 = vector.shape_cast %30 : vector<8x64xf32> to vector<1x8x64xf32>
    tpu.vector_store %arg6[%c0_8, %c0_9, %c0_10], %33 {strides = array<i32>} : memref<1x8x64xf32, #tpu.memory_space<vmem>>, vector<1x8x64xf32>,
    return
  }
  func.func @transform_0(%arg0: i32, %arg1: i32) -> (i32, i32, i32) {
    %c0_i32 = arith.constant 0 : i32
    %c0_i32_0 = arith.constant 0 : i32
    return %arg0, %c0_i32, %arg1 : i32, i32, i32
  }
  func.func @transform_1(%arg0: i32, %arg1: i32) -> (i32, i32) {
    %c0_i32 = arith.constant 0 : i32
    %c0_i32_0 = arith.constant 0 : i32
    %c0_i32_1 = arith.constant 0 : i32
    return %c0_i32, %c0_i32_0 : i32, i32
  }
  func.func @transform_2(%arg0: i32, %arg1: i32) -> (i32, i32) {
    %c0_i32 = arith.constant 0 : i32
    %c0_i32_0 = arith.constant 0 : i32
    %c0_i32_1 = arith.constant 0 : i32
    return %c0_i32, %c0_i32_0 : i32, i32
  }
  func.func @transform_3(%arg0: i32, %arg1: i32) -> (i32, i32) {
    %c0_i32 = arith.constant 0 : i32
    %c0_i32_0 = arith.constant 0 : i32
    %c0_i32_1 = arith.constant 0 : i32
    return %c0_i32, %c0_i32_0 : i32, i32
  }
  func.func @transform_4(%arg0: i32, %arg1: i32) -> (i32, i32, i32) {
    %c0_i32 = arith.constant 0 : i32
    %c0_i32_0 = arith.constant 0 : i32
    return %arg0, %c0_i32, %arg1 : i32, i32, i32
  }
}

</mosaic_0001>

<bundles_post_ra>
// kernel: tpu_custom_call.1
= control target key start
LH: loop header
LB: loop body
LE: loop exit
PB: predicated region body
PF: predicated region fallthrough
CT: control target
= control target key end

     0   :  { %9 = vsyncpa [#allocation3], 0  ;;  %s823_s0 = inlined_call_operand.vmem [shape: f32[2,4,256], index: 0, kind: input, shape index: {}]   ;;  %s824_s1 = inlined_call_operand.vmem [shape: f32[256,64], index: 1, kind: input, shape index: {}]   ;;  %s825_s2 = inlined_call_operand.vmem [shape: f32[8,4], index: 2, kind: input, shape index: {}]   ;;  %s826_s3 = inlined_call_operand.vmem [shape: f32[8,1], index: 3, kind: input, shape index: {}]   ;;  %s827_s4 = inlined_call_operand.hbm [shape: f32[2,8,64], index: 4, kind: output, shape index: {}]  }
   0x1   :  { %11 = vsyncpa [#allocation3 + $0x1], 0  ;;  %s621_s15 = smov 0   ;;  %s623_s16 = smov 0  }
   0x2   :  { %s625_s17 = smov 0   ;;  %s627_s18 = smov 0  }
   0x3   :  { %s629_s19 = smov 0   ;;  %s631_s20 = smov 0  }
   0x4 LB: > { %s434_s21 = sadd.s32 4294967295, %s590_s20   ;;  %s435_s22 = sadd.s32 4294967294, %s590_s20   ;;  %s590_s20 = sphi %s631_s20, %s17_s20   ;;  %s586_s19 = sphi %s629_s19, %s834_s19   ;;  %s582_s18 = sphi %s627_s18, %s833_s18   ;;  %s578_s17 = sphi %s625_s17, %s832_s17   ;;  %s574_s16 = sphi %s623_s16, %s831_s16   ;;  %s570_s15 = sphi %s621_s15, %s830_s15  }
   0x5   : > { %s29_s23 = sadd.s32 1, %s586_s19  ;;  %s129_s24 = sadd.s32 1, %s578_s17 }
   0x6   : > { %p31_p0 = scmp.ge.s32.totalorder %s29_s23, 2  ;;  %p139_p1 = scmp.ne.s32.totalorder %s578_s17, %s574_s16 }
   0x7   : > { %p140_p2 = scmp.eq.s32.totalorder %s434_s21, 1  ;;  %p145_p3 = scmp.ne.s32.totalorder %s574_s16, %s570_s15 }
   0x8   : > { %s836_s23 = smov (%p31_p0, %s29_s23), 0  ;;  %p146_p5 = scmp.eq.s32.totalorder %s435_s22, 1 }
   0x9   : > { %p661_p4 = por %p140_p2, %p139_p1  ;;  %s124_s26 = ssub.s32 %s586_s19, %s836_s23 }
   0xa   : > { %p438_p6 = scmp.ge.s32.totalorder %s590_s20, 1  ;;  %p127_p7 = scmp.eq.s32.totalorder %s124_s26, 0 }
   0xb   : > { %p668_p8 = por %p146_p5, %p145_p3  ;;  %p186_p9 = scmp.lt.s32.totalorder %s590_s20, 3 }
   0xc   : > { %s674_s28 = scalar_select %p127_p7, %s578_s17, %s129_s24  }
   0xd   : > { %p187_p10 = pnand %p438_p6, %p186_p9 }
   0xe   : > { %p217_p11 = scmp.lt.s32.totalorder (!%p187_p10), %s582_s18, 1  ;;  %s443_s14 = sshll.u32 (!%p187_p10), %s582_s18, 3 }
   0xf   : > { %190 = sbr.rel (%p187_p10) target bundleno = 196 (0xc4), region = 36  ;;  %s355_s24 = scalar_lea.hbm (!%p187_p10), %s827_s4, %s443_s14 }
  0x10   : > { %s532_s9 = scalar_lea.hbm (!%p187_p10), %s827_s4, 16 }
  0x14   : > { %v242_v0 = vld [vmem:[%s824_s1 + $0x78] sm:$0xff]  ;;  %v241_v2 = vld [vmem:[%s824_s1 + $0x70] sm:$0xff]  ;;  %v240_v4 = vld [vmem:[%s824_s1 + $0x68] sm:$0xff]  ;;  %s218_s21 = scalar_select %p217_p11, %s582_s18, 1  ;;  %v592_v6 = vmov 2   ;;  %v593_v7 = vmov 0  }
  0x15   : > { %v258_v1 = vld [vmem:[%s824_s1 + $0xf8] sm:$0xff]  ;;  %265 = vmatpush.msra.mxu0 %v242_v0  ;;  %v257_v3 = vld [vmem:[%s824_s1 + $0xf0] sm:$0xff]  ;;  %v256_v5 = vld [vmem:[%s824_s1 + $0xe8] sm:$0xff]  ;;  %508 = vset.pattern.permute.xlu1 %v592_v6  ;;  %v594_v29 = vmov 3   ;;  %v595_v30 = vmov 1   ;;  %vm341_vm0 = vcmask 523264  }
  0x16   : > { %285 = vmatpush.msra.mxu1 %v258_v1  ;;  %506 = vset.pattern.permute.xlu0 %v593_v7  ;;  %v239_v8 = vld [vmem:[%s824_s1 + $0x60] sm:$0xff]  ;;  %s446_s30 = sshll.u32 %s218_s21, 3  ;;  %v238_v10 = vld [vmem:[%s824_s1 + $0x58] sm:$0xff]  ;;  %v237_v12 = vld [vmem:[%s824_s1 + $0x50] sm:$0xff] }
  0x17   : > { %266 = vmatpush.msra.mxu0 %v241_v2  ;;  %v255_v9 = vld [vmem:[%s824_s1 + $0xe0] sm:$0xff]  ;;  %510 = vset.pattern.permute.xlu2 %v593_v7  ;;  %v254_v11 = vld [vmem:[%s824_s1 + $0xd8] sm:$0xff]  ;;  %s224_s11 = scalar_lea.vmem %s823_s0, %s446_s30  ;;  %v253_v13 = vld [vmem:[%s824_s1 + $0xd0] sm:$0xff]  ;;  %s359_s30 = sshll.u32 %s355_s24, 4  ;;  %s360_s30 = int_to_ptr.hbm [resolvable:$true] %s359_s30 }
  0x18   : > { %286 = vmatpush.msra.mxu1 %v257_v3  ;;  %v236_v14 = vld [vmem:[%s824_s1 + $0x48] sm:$0xff]  ;;  %v226_v16 = vld [vmem:[%s224_s11] sm:$0xff]  ;;  %v234_v21 = vld [vmem:[%s824_s1 + $0x38] sm:$0xff]  ;;  %s213_s11 = sand.u32 1, %s574_s16   ;;  %s526_s5 = sshra.s32 %s360_s30, 4  ;;  %s527_s5 = int_to_ptr.hbm [resolvable:$true] %s526_s5 }
  0x19   : > { %267 = vmatpush.msra.mxu0 %v240_v4  ;;  %v252_v15 = vld [vmem:[%s824_s1 + $0xc8] sm:$0xff]  ;;  %260 = vst [vmem:[#allocation1] ss:$2 sm:$0xff] %v226_v16  ;;  %v305_v17 = vld [vmem:[%s825_s2] sm:$0xff]  ;;  %v250_v22 = vld [vmem:[%s824_s1 + $0xb8] sm:$0xff]  ;;  %s439_s13 = sshll.u32 %s213_s11, 3  ;;  %p533_p1 = scmp.lt.s32.totalorder %s527_s5, %s827_s4 }
  0x1a   : > { %287 = vmatpush.msra.mxu1 %v256_v5  ;;  %v334_v18 = vld [vmem:[%s826_s3] sm:$0xff]  ;;  %321 = vperm.xlu1 %508, %v305_v17   ;;  %v233_v23 = vld [vmem:[%s824_s1 + $0x30] sm:$0xff]  ;;  %v232_v25 = vld [vmem:[%s824_s1 + $0x28] sm:$0xff]  ;;  %s215_s26 = scalar_lea.vmem [#allocation2], %s439_s13  ;;  %s344_s18 = scalar_lea.sflag [#allocation3], %s213_s11 }
  0x1b   : > { %268 = vmatpush.msra.mxu0 %v239_v8  ;;  %v235_v19 = vld [vmem:[%s824_s1 + $0x40] sm:$0xff]  ;;  %308 = vperm.xlu0 %506, %v305_v17   ;;  %v249_v24 = vld [vmem:[%s824_s1 + $0xb0] sm:$0xff]  ;;  %v248_v26 = vld [vmem:[%s824_s1 + $0xa8] sm:$0xff]  ;;  %s357_s29 = sshll.u32 %s215_s26, 4  ;;  %s528_s6 = scalar_lea.hbm %s527_s5, 8  ;;  %s358_s29 = int_to_ptr.vmem [resolvable:$true] %s357_s29 }
  0x1c   : > { %288 = vmatpush.msra.mxu1 %v255_v9  ;;  %v251_v20 = vld [vmem:[%s824_s1 + $0xc0] sm:$0xff]  ;;  %337 = vperm.xlu2 %510, %v334_v18   ;;  %v230_v31 = vld [vmem:[%s824_s1 + $0x18] sm:$0xff]  ;;  %v229_v33 = vld [vmem:[%s824_s1 + $0x10] sm:$0xff]  ;;  %p529_p12 = scmp.ne.s32.totalorder %s527_s5, %s528_s6  ;;  %p534_p2 = scmp.lt.s32.totalorder %s532_s9, %s528_s6 }
  0x1d   : > { %269 = vmatpush.msra.mxu0 %v238_v10  ;;  %v231_v27 = vld [vmem:[%s824_s1 + $0x20] sm:$0xff]  ;;  %v246_v32 = vld [vmem:[%s824_s1 + $0x98] sm:$0xff]  ;;  %v245_v34 = vld [vmem:[%s824_s1 + $0x90] sm:$0xff] }
  0x1e   : > { %289 = vmatpush.msra.mxu1 %v254_v11  ;;  %v247_v28 = vld [vmem:[%s824_s1 + $0xa0] sm:$0xff]  ;;  %v228_v35 = vld [vmem:[%s824_s1 + $0x8] sm:$0xff]  ;;  %p530_p13 = pnand %p529_p12, %p661_p4  ;;  %p535_p3 = por %p534_p2, %p533_p1 }
  0x1f   : > { %270 = vmatpush.msra.mxu0 %v237_v12  ;;  %v244_v36 = vld [vmem:[%s824_s1 + $0x88] sm:$0xff]  ;;  %v227_v37 = vld [vmem:[%s824_s1] sm:$0xff] }
  0x20   : > { %290 = vmatpush.msra.mxu1 %v253_v13  ;;  %v243_v38 = vld [vmem:[%s824_s1 + $0x80] sm:$0xff]  ;;  %v262_v40 = vld.sshfl [vmem:[#allocation1 + $0x8] sm:$0xff pattern:$0x75316420]  ;;  %p531_p0 = pneg %p530_p13 }
  0x21   : > { %271 = vmatpush.msra.mxu0 %v236_v14  ;;  %v261_v39 = vld.sshfl [vmem:[#allocation1] sm:$0xff pattern:$0x75316420] }
  0x22   : > { %291 = vmatpush.msra.mxu1 %v252_v15  ;;  %509 = vset.pattern.permute.xlu1 %v594_v29  ;;  %p536_p5 = pnand %p535_p3, %p531_p0 }
  0x23   : > { %272 = vmatpush.msra.mxu0 %v235_v19  ;;  %507 = vset.pattern.permute.xlu0 %v595_v30 }
  0x24   : > { %292 = vmatpush.msra.mxu1 %v251_v20  ;;  %328 = vperm.xlu1 %509, %v305_v17  }
  0x25   : > { %273 = vmatpush.msra.mxu0 %v234_v21  ;;  %314 = vperm.xlu0 %507, %v305_v17  }
  0x26   : > { %293 = vmatpush.msra.mxu1 %v250_v22 }
  0x27   : > { %274 = vmatpush.msra.mxu0 %v233_v23 }
  0x28   : > { %294 = vmatpush.msra.mxu1 %v249_v24 }
  0x29   : > { %275 = vmatpush.msra.mxu0 %v232_v25 }
  0x2a   : > { %295 = vmatpush.msra.mxu1 %v248_v26 }
  0x2b   : > { %276 = vmatpush.msra.mxu0 %v231_v27 }
  0x2c   : > { %296 = vmatpush.msra.mxu1 %v247_v28 }
  0x2d   : > { %277 = vmatpush.msra.mxu0 %v230_v31  ;;  %511 = vset.pattern.permute.xlu0 %v593_v7 }
  0x2e   : > { %297 = vmatpush.msra.mxu1 %v246_v32 }
  0x2f   : > { %278 = vmatpush.msra.mxu0 %v229_v33 }
  0x30   : > { %298 = vmatpush.msra.mxu1 %v245_v34 }
  0x31   : > { %279 = vmatpush.msra.mxu0 %v228_v35 }
  0x32   : > { %299 = vmatpush.msra.mxu1 %v244_v36 }
  0x33   : > { %280 = vmatpush.msra.mxu0 %v227_v37 }
  0x34   : > { %300 = vmatpush.msra.mxu1 %v243_v38  ;;  %281 = vmatmul.f32.vlgmr.msra.gmra.mxu0 %v261_v39 }
  0x35   : > { %301 = vmatmul.f32.vlgmr.msra.gmra.mxu1 %v262_v40 }
  0x76   : > { %v338_v58 = vpop.permute.xlu2 %337 }
  0x8c   : > { %v322_v42 = vpop.permute.xlu1 %321 }
  0x8d   : > { %v309_v41 = vpop.permute.xlu0 %308 }
  0x96   : > { %v329_v53 = vpop.permute.xlu1 %328 }
  0x97   : > { %v315_v46 = vpop.permute.xlu0 %314 }
  0xb1   : > { %v282_v43 = vpop.f32.mrf.mxu0 }
  0xb2   : > { %v302_v44 = vpop.f32.mrf.mxu1 }
  0xb3   : > { %v303_v45 = vadd.f32 %v302_v44, %v282_v43 }
  0xb5   : > { %v311_v47 = vperm.slane %v303_v45, 0  ;;  %v317_v48 = vperm.slane %v303_v45, 1  ;;  %v324_v49 = vperm.slane %v303_v45, 2  ;;  %v331_v50 = vperm.slane %v303_v45, 3 }
  0xb7   : > { %v312_v51 = vmul.f32 %v311_v47, %v309_v41  ;;  %v318_v52 = vmul.f32 %v317_v48, %v315_v46  ;;  %v325_v55 = vmul.f32 %v324_v49, %v322_v42  ;;  %v332_v56 = vmul.f32 %v331_v50, %v329_v53 }
  0xb9   : > { %v319_v54 = vadd.f32 %v318_v52, %v312_v51 }
  0xbb   : > { %v326_v57 = vadd.f32 %v325_v55, %v319_v54 }
  0xbd   : > { %v333_v59 = vadd.f32 %v332_v56, %v326_v57 }
  0xbf   : > { %v340_v60 = vadd.f32 %v338_v58, %v333_v59 }
  0xc1   : > { %342 = vst.msk [vmem:[%s215_s26] sm:$0xff] %vm341_vm0, %v340_v60 }
  0xc2   : > { %539 = shalt.err (!%p536_p5)
}
  0xc3   : > { %447 = dma.vmem_to_hbm [thread:$0]  (%p661_p4), %s358_s29, 128, %s360_s30, %s344_s18  }
  0xc4 PF: > { %p453_p6 = scmp.ge.s32.totalorder %s590_s20, 2  ;;  %s371_s11 = sand.u32 1, %s570_s15  }
  0xc5   : > { %s372_s13 = scalar_lea.sflag [#allocation3], %s371_s11 }
  0xc6   : > { %p450_p7 = pnand %p453_p6, %p668_p8 }
  0xc8   : > { %p451_p9 = pneg %p450_p7 }
  0xca   : > { %565 = dma.done.wait (%p451_p9), %s372_s13, 128  }
  0xcb   : > { %567 = vsyncadd (%p451_p9), %s372_s13, 4294967168  ;;  %s17_s20 = sadd.s32 1, %s590_s20   ;;  %s830_s15 = smov %s574_s16 }
  0xcc   : > { %p14_p10 = scmp.ge.s32.totalorder %s17_s20, 4   ;;  %s831_s16 = smov %s578_s17 }
  0xcd   : > { %s832_s17 = smov %s674_s28  ;;  %s833_s18 = smov %s586_s19 }
  0xce   : > { %s834_s19 = smov %s836_s23  ;;  %16 = sbr.rel (!%p14_p10) target bundleno = 4 (0x4), region = 71 }
  0xd3   :  { %378 = vsyncpa [#allocation3], 1 }
  0xd4   :  { %380 = vsyncpa [#allocation3 + $0x1], 1 }

</bundles_post_ra>
